<compile_context>
chip_gen: v6e
topology: v6e:2x2x1
jax: 0.10.0
libtpu: 0.0.40
codegen_flags: <defaults>
</compile_context>

<pallas_src>
import jax
import jax.numpy as jnp
from jax.experimental import pallas as pl
from jax.experimental.pallas import tpu as pltpu


def _round_up(x, m):
    return ((x + m - 1) // m) * m


def _nf_kernel(zt_ref, wt_ref, st_ref, b_ref, c_ref, zk_ref, lj_ref):
    # zt_ref: (D, TB)   wt_ref/st_ref: (D, L)   b_ref/c_ref: (1, L)
    # zk_ref: (D, TB)   lj_ref: (L, TB)
    z = zt_ref[...]                                   # (D, TB) f32, lives in vregs
    num_flows = lj_ref.shape[0]

    # Row index used to place each flow's (1, TB) log-jacobian into its row of
    # the (L, TB) accumulator with a cheap VPU select, so the output is written
    # with a single batched store instead of L masked sub-row stores.
    row_ids = jax.lax.broadcasted_iota(jnp.int32, (num_flows, 1), 0)
    lj_acc = jnp.zeros(lj_ref.shape, jnp.float32)

    # flow_length is small -> static unroll.
    # TODO(synk): switch to lax.fori_loop(..., unroll=True) if flow_length grows.
    for k in range(num_flows):
        w = wt_ref[:, k:k + 1]                        # (D, 1)
        s = st_ref[:, k:k + 1]                        # (D, 1)
        b = b_ref[0:1, k:k + 1]                       # (1, 1)
        c = c_ref[0:1, k:k + 1]                       # (1, 1) = dot(w_k, s_k)
        # activation = z @ W^T + b  -> (1, TB): 8-sublane reduce, lane-dense
        act = jnp.sum(z * w, axis=0, keepdims=True) + b
        t = jnp.tanh(act)                             # (1, TB)   EUP
        # exact identity: det_grad = 1 + (1 - tanh^2(act)) * dot(w_k, s_k)
        det_grad = 1.0 + (1.0 - t * t) * c            # (1, TB)
        lj_row = jnp.log(jnp.abs(det_grad) + 1e-7)    # (1, TB)   EUP
        lj_acc = jnp.where(row_ids == k, lj_row, lj_acc)
        # planar flow transform (log-det uses pre-transform z, as in PyTorch)
        z = z + s * t                                 # (D, TB)

    lj_ref[...] = lj_acc                              # single lane-dense store
    zk_ref[...] = z


def _pick_batch_tile(batch, max_tb):
    """Lane tile (multiple of 128).  Big enough to amortize the ~0.35 us
    per-grid-step overhead, but split so the 1-D grid has >= 2 steps whenever
    the batch is large enough (lets v7x shard the parallel axis over both
    TensorCores; harmless on single-core v5e/v6e)."""
    bp = _round_up(batch, 128)
    tb = min(max_tb, bp)
    if tb == bp and bp >= 2048:            # grid would collapse to one step
        tb = _round_up(pl.cdiv(bp, 2), 128)
    return tb


def normalizing_flow_forward(z, weights, biases, scales, *, max_tb=32768):
    """z: (B, D); weights/scales: (L, D); biases: (L,).  Returns (zk, [lj_k])."""
    z = jnp.asarray(z, jnp.float32)
    weights = jnp.asarray(weights, jnp.float32)
    scales = jnp.asarray(scales, jnp.float32)
    biases = jnp.asarray(biases, jnp.float32).reshape(-1)

    B, D = z.shape
    L = weights.shape[0]

    TB = _pick_batch_tile(B, max_tb)
    # Ragged last block: OOB tail lanes read garbage (only feeds tanh/log in
    # lanes that are never stored); OOB writes are dropped.  No padded copies.
    grid = (pl.cdiv(B, TB),)

    # Working layout is z^T: D (=8) on sublanes, batch on lanes, so act / tanh
    # / log are lane-dense (1, TB) vectors and the D-reduction is a cheap
    # 8-sublane reduce (no MXU -- D is tiny).
    zt = z.T                                          # (D, B)
    wt = weights.T                                    # (D, L)
    st = scales.T                                     # (D, L)
    b2 = biases.reshape(1, L)                         # (1, L)
    c2 = jnp.sum(weights * scales, axis=1).reshape(1, L)   # (1, L) dot(w_k, s_k)

    cost = pl.CostEstimate(
        flops=10 * L * D * B,
        transcendentals=2 * L * B,
        bytes_accessed=(2 * D + L) * B * 4,
    )

    zk_t, lj = pl.pallas_call(
        _nf_kernel,
        out_shape=(
            jax.ShapeDtypeStruct((D, B), jnp.float32),
            jax.ShapeDtypeStruct((L, B), jnp.float32),
        ),
        grid=grid,
        in_specs=[
            pl.BlockSpec((D, TB), lambda i: (0, i)),  # z^T batch tile
            pl.BlockSpec((D, L), lambda i: (0, 0)),   # W^T (all flows)
            pl.BlockSpec((D, L), lambda i: (0, 0)),   # S^T (all flows)
            pl.BlockSpec((1, L), lambda i: (0, 0)),   # biases
            pl.BlockSpec((1, L), lambda i: (0, 0)),   # dot(w_k, s_k)
        ],
        out_specs=(
            pl.BlockSpec((D, TB), lambda i: (0, i)),  # z_K^T batch tile
            pl.BlockSpec((L, TB), lambda i: (0, i)),  # lane-dense log-jacobians
        ),
        compiler_params=pltpu.CompilerParams(
            dimension_semantics=("parallel",),
            vmem_limit_bytes=32 * 1024 * 1024,
        ),
        cost_estimate=cost,
    )(zt, wt, st, b2, c2)

    zk = zk_t.T                                       # (B, D)
    # Per-flow (B, 1) list, built lazily from the single lane-dense array.
    log_jacobians = [lj[k].reshape(B, 1) for k in range(L)]
    return zk, log_jacobians


def _reference_forward(z, weights, biases, scales):
    # pure-JAX reference of the PyTorch module
    L = weights.shape[0]
    ljs = []
    for k in range(L):
        w = weights[k][None, :]           # (1, D)
        s = scales[k][None, :]            # (1, D)
        b = biases[k]
        act = z @ w.T + b                 # (B, 1)
        t = jnp.tanh(act)
        psi = (1.0 - t * t) * w           # (B, D)
        det_grad = 1.0 + psi @ s.T        # (B, 1)
        ljs.append(jnp.log(jnp.abs(det_grad) + 1e-7))
        z = z + s * t
    return z, ljs


if __name__ == "__main__":
    B, D, L = 256, 8, 4   # batch, latent dim, flow_length

    key = jax.random.PRNGKey(0)
    kz, kw, ks, kb = jax.random.split(key, 4)
    z = jax.random.normal(kz, (B, D), dtype=jnp.float32)
    # reset_parameters(): uniform(-0.01, 0.01)
    weights = jax.random.uniform(kw, (L, D), jnp.float32, -0.01, 0.01)
    scales = jax.random.uniform(ks, (L, D), jnp.float32, -0.01, 0.01)
    biases = jax.random.uniform(kb, (L,), jnp.float32, -0.01, 0.01)

    zk, log_jacobians = normalizing_flow_forward(z, weights, biases, scales)
    jax.block_until_ready(zk)
    for lj in log_jacobians:
        jax.block_until_ready(lj)

    # correctness check against pure-JAX reference
    zk_ref, ljs_ref = _reference_forward(z, weights, biases, scales)
    assert zk.shape == (B, D)
    assert jnp.allclose(zk, zk_ref, atol=1e-5, rtol=1e-5)
    for a, b in zip(log_jacobians, ljs_ref):
        assert a.shape == (B, 1)
        assert jnp.allclose(a, b, atol=1e-5, rtol=1e-5)

    print("KERNEL_OK")
</pallas_src>

<mosaic_0001>
module attributes {stable_mosaic.version = 11 : i64} {
  func.func @_nf_kernel(%arg0: i32, %arg1: memref<8x256xf32, #tpu.memory_space<vmem>>, %arg2: memref<8x4xf32, #tpu.memory_space<vmem>>, %arg3: memref<8x4xf32, #tpu.memory_space<vmem>>, %arg4: memref<1x4xf32, #tpu.memory_space<vmem>>, %arg5: memref<1x4xf32, #tpu.memory_space<vmem>>, %arg6: memref<8x256xf32, #tpu.memory_space<vmem>>, %arg7: memref<4x256xf32, #tpu.memory_space<vmem>>) attributes {dimension_semantics = [#tpu.dimension_semantics<parallel>], iteration_bounds = array<i64: 1>, scalar_prefetch = 0 : i64, scratch_operands = 0 : i64, tpu.core_type = #tpu.core_type<tc>, window_params = [{transform_indices = @transform_0, window_bounds = array<i64: 8, 256>}, {pipeline_mode = #tpu.pipeline_mode<synchronous>, transform_indices = @transform_1, window_bounds = array<i64: 8, 4>}, {pipeline_mode = #tpu.pipeline_mode<synchronous>, transform_indices = @transform_2, window_bounds = array<i64: 8, 4>}, {pipeline_mode = #tpu.pipeline_mode<synchronous>, transform_indices = @transform_3, window_bounds = array<i64: 1, 4>}, {pipeline_mode = #tpu.pipeline_mode<synchronous>, transform_indices = @transform_4, window_bounds = array<i64: 1, 4>}, {transform_indices = @transform_5, window_bounds = array<i64: 8, 256>}, {transform_indices = @transform_6, window_bounds = array<i64: 4, 256>}]} {
    %c0 = arith.constant 0 : index
    %c0_0 = arith.constant 0 : index
    %0 = vector.load %arg1[%c0, %c0_0] : memref<8x256xf32, #tpu.memory_space<vmem>>, vector<8x256xf32>
    %1 = tpu.iota {dimensions = array<i32: 0>} : vector<4x1xi32>
    %cst = arith.constant 0.000000e+00 : f32
    %2 = vector.broadcast %cst : f32 to vector<4x256xf32>
    %c0_1 = arith.constant 0 : index
    %c0_2 = arith.constant 0 : index
    %3 = vector.load %arg2[%c0_1, %c0_2] : memref<8x4xf32, #tpu.memory_space<vmem>>, vector<8x1xf32>
    %c0_3 = arith.constant 0 : index
    %c0_4 = arith.constant 0 : index
    %4 = vector.load %arg3[%c0_3, %c0_4] : memref<8x4xf32, #tpu.memory_space<vmem>>, vector<8x1xf32>
    %c0_5 = arith.constant 0 : index
    %c0_6 = arith.constant 0 : index
    %5 = vector.load %arg4[%c0_5, %c0_6] : memref<1x4xf32, #tpu.memory_space<vmem>>, vector<1x1xf32>
    %c0_7 = arith.constant 0 : index
    %c0_8 = arith.constant 0 : index
    %6 = vector.load %arg5[%c0_7, %c0_8] : memref<1x4xf32, #tpu.memory_space<vmem>>, vector<1x1xf32>
    %7 = vector.broadcast %3 : vector<8x1xf32> to vector<8x256xf32>
    %8 = arith.mulf %0, %7 : vector<8x256xf32>
    %cst_9 = arith.constant dense<0.000000e+00> : vector<256xf32>
    %9 = vector.multi_reduction <add>, %8, %cst_9 [0] : vector<8x256xf32> to vector<256xf32>
    %10 = vector.shape_cast %9 : vector<256xf32> to vector<1x256xf32>
    %11 = vector.broadcast %5 : vector<1x1xf32> to vector<1x256xf32>
    %12 = arith.addf %10, %11 : vector<1x256xf32>
    %13 = math.tanh %12 : vector<1x256xf32>
    %14 = arith.mulf %13, %13 : vector<1x256xf32>
    %cst_10 = arith.constant 1.000000e+00 : f32
    %15 = vector.broadcast %cst_10 : f32 to vector<1x256xf32>
    %16 = arith.subf %15, %14 : vector<1x256xf32>
    %17 = vector.broadcast %6 : vector<1x1xf32> to vector<1x256xf32>
    %18 = arith.mulf %16, %17 : vector<1x256xf32>
    %cst_11 = arith.constant 1.000000e+00 : f32
    %19 = vector.broadcast %cst_11 : f32 to vector<1x256xf32>
    %20 = arith.addf %19, %18 : vector<1x256xf32>
    %21 = math.absf %20 : vector<1x256xf32>
    %cst_12 = arith.constant 1.000000e-07 : f32
    %22 = vector.broadcast %cst_12 : f32 to vector<1x256xf32>
    %23 = arith.addf %21, %22 : vector<1x256xf32>
    %24 = math.log %23 : vector<1x256xf32>
    %c0_i32 = arith.constant 0 : i32
    %25 = vector.broadcast %c0_i32 : i32 to vector<4x1xi32>
    %26 = arith.cmpi eq, %1, %25 : vector<4x1xi32>
    %27 = vector.shape_cast %26 : vector<4x1xi1> to vector<4x1xi1>
    %28 = vector.broadcast %27 : vector<4x1xi1> to vector<4x256xi1>
    %29 = vector.shape_cast %24 : vector<1x256xf32> to vector<1x256xf32>
    %30 = vector.broadcast %29 : vector<1x256xf32> to vector<4x256xf32>
    %31 = arith.select %28, %30, %2 : vector<4x256xi1>, vector<4x256xf32>
    %32 = vector.broadcast %4 : vector<8x1xf32> to vector<8x256xf32>
    %33 = vector.broadcast %13 : vector<1x256xf32> to vector<8x256xf32>
    %34 = arith.mulf %32, %33 : vector<8x256xf32>
    %35 = arith.addf %0, %34 : vector<8x256xf32>
    %c0_13 = arith.constant 0 : index
    %c1 = arith.constant 1 : index
    %36 = vector.load %arg2[%c0_13, %c1] : memref<8x4xf32, #tpu.memory_space<vmem>>, vector<8x1xf32>
    %c0_14 = arith.constant 0 : index
    %c1_15 = arith.constant 1 : index
    %37 = vector.load %arg3[%c0_14, %c1_15] : memref<8x4xf32, #tpu.memory_space<vmem>>, vector<8x1xf32>
    %c0_16 = arith.constant 0 : index
    %c1_17 = arith.constant 1 : index
    %38 = vector.load %arg4[%c0_16, %c1_17] : memref<1x4xf32, #tpu.memory_space<vmem>>, vector<1x1xf32>
    %c0_18 = arith.constant 0 : index
    %c1_19 = arith.constant 1 : index
    %39 = vector.load %arg5[%c0_18, %c1_19] : memref<1x4xf32, #tpu.memory_space<vmem>>, vector<1x1xf32>
    %40 = vector.broadcast %36 : vector<8x1xf32> to vector<8x256xf32>
    %41 = arith.mulf %35, %40 : vector<8x256xf32>
    %cst_20 = arith.constant dense<0.000000e+00> : vector<256xf32>
    %42 = vector.multi_reduction <add>, %41, %cst_20 [0] : vector<8x256xf32> to vector<256xf32>
    %43 = vector.shape_cast %42 : vector<256xf32> to vector<1x256xf32>
    %44 = vector.broadcast %38 : vector<1x1xf32> to vector<1x256xf32>
    %45 = arith.addf %43, %44 : vector<1x256xf32>
    %46 = math.tanh %45 : vector<1x256xf32>
    %47 = arith.mulf %46, %46 : vector<1x256xf32>
    %cst_21 = arith.constant 1.000000e+00 : f32
    %48 = vector.broadcast %cst_21 : f32 to vector<1x256xf32>
    %49 = arith.subf %48, %47 : vector<1x256xf32>
    %50 = vector.broadcast %39 : vector<1x1xf32> to vector<1x256xf32>
    %51 = arith.mulf %49, %50 : vector<1x256xf32>
    %cst_22 = arith.constant 1.000000e+00 : f32
    %52 = vector.broadcast %cst_22 : f32 to vector<1x256xf32>
    %53 = arith.addf %52, %51 : vector<1x256xf32>
    %54 = math.absf %53 : vector<1x256xf32>
    %cst_23 = arith.constant 1.000000e-07 : f32
    %55 = vector.broadcast %cst_23 : f32 to vector<1x256xf32>
    %56 = arith.addf %54, %55 : vector<1x256xf32>
    %57 = math.log %56 : vector<1x256xf32>
    %c1_i32 = arith.constant 1 : i32
    %58 = vector.broadcast %c1_i32 : i32 to vector<4x1xi32>
    %59 = arith.cmpi eq, %1, %58 : vector<4x1xi32>
    %60 = vector.shape_cast %59 : vector<4x1xi1> to vector<4x1xi1>
    %61 = vector.broadcast %60 : vector<4x1xi1> to vector<4x256xi1>
    %62 = vector.shape_cast %57 : vector<1x256xf32> to vector<1x256xf32>
    %63 = vector.broadcast %62 : vector<1x256xf32> to vector<4x256xf32>
    %64 = arith.select %61, %63, %31 : vector<4x256xi1>, vector<4x256xf32>
    %65 = vector.broadcast %37 : vector<8x1xf32> to vector<8x256xf32>
    %66 = vector.broadcast %46 : vector<1x256xf32> to vector<8x256xf32>
    %67 = arith.mulf %65, %66 : vector<8x256xf32>
    %68 = arith.addf %35, %67 : vector<8x256xf32>
    %c0_24 = arith.constant 0 : index
    %c2 = arith.constant 2 : index
    %69 = vector.load %arg2[%c0_24, %c2] : memref<8x4xf32, #tpu.memory_space<vmem>>, vector<8x1xf32>
    %c0_25 = arith.constant 0 : index
    %c2_26 = arith.constant 2 : index
    %70 = vector.load %arg3[%c0_25, %c2_26] : memref<8x4xf32, #tpu.memory_space<vmem>>, vector<8x1xf32>
    %c0_27 = arith.constant 0 : index
    %c2_28 = arith.constant 2 : index
    %71 = vector.load %arg4[%c0_27, %c2_28] : memref<1x4xf32, #tpu.memory_space<vmem>>, vector<1x1xf32>
    %c0_29 = arith.constant 0 : index
    %c2_30 = arith.constant 2 : index
    %72 = vector.load %arg5[%c0_29, %c2_30] : memref<1x4xf32, #tpu.memory_space<vmem>>, vector<1x1xf32>
    %73 = vector.broadcast %69 : vector<8x1xf32> to vector<8x256xf32>
    %74 = arith.mulf %68, %73 : vector<8x256xf32>
    %cst_31 = arith.constant dense<0.000000e+00> : vector<256xf32>
    %75 = vector.multi_reduction <add>, %74, %cst_31 [0] : vector<8x256xf32> to vector<256xf32>
    %76 = vector.shape_cast %75 : vector<256xf32> to vector<1x256xf32>
    %77 = vector.broadcast %71 : vector<1x1xf32> to vector<1x256xf32>
    %78 = arith.addf %76, %77 : vector<1x256xf32>
    %79 = math.tanh %78 : vector<1x256xf32>
    %80 = arith.mulf %79, %79 : vector<1x256xf32>
    %cst_32 = arith.constant 1.000000e+00 : f32
    %81 = vector.broadcast %cst_32 : f32 to vector<1x256xf32>
    %82 = arith.subf %81, %80 : vector<1x256xf32>
    %83 = vector.broadcast %72 : vector<1x1xf32> to vector<1x256xf32>
    %84 = arith.mulf %82, %83 : vector<1x256xf32>
    %cst_33 = arith.constant 1.000000e+00 : f32
    %85 = vector.broadcast %cst_33 : f32 to vector<1x256xf32>
    %86 = arith.addf %85, %84 : vector<1x256xf32>
    %87 = math.absf %86 : vector<1x256xf32>
    %cst_34 = arith.constant 1.000000e-07 : f32
    %88 = vector.broadcast %cst_34 : f32 to vector<1x256xf32>
    %89 = arith.addf %87, %88 : vector<1x256xf32>
    %90 = math.log %89 : vector<1x256xf32>
    %c2_i32 = arith.constant 2 : i32
    %91 = vector.broadcast %c2_i32 : i32 to vector<4x1xi32>
    %92 = arith.cmpi eq, %1, %91 : vector<4x1xi32>
    %93 = vector.shape_cast %92 : vector<4x1xi1> to vector<4x1xi1>
    %94 = vector.broadcast %93 : vector<4x1xi1> to vector<4x256xi1>
    %95 = vector.shape_cast %90 : vector<1x256xf32> to vector<1x256xf32>
    %96 = vector.broadcast %95 : vector<1x256xf32> to vector<4x256xf32>
    %97 = arith.select %94, %96, %64 : vector<4x256xi1>, vector<4x256xf32>
    %98 = vector.broadcast %70 : vector<8x1xf32> to vector<8x256xf32>
    %99 = vector.broadcast %79 : vector<1x256xf32> to vector<8x256xf32>
    %100 = arith.mulf %98, %99 : vector<8x256xf32>
    %101 = arith.addf %68, %100 : vector<8x256xf32>
    %c0_35 = arith.constant 0 : index
    %c3 = arith.constant 3 : index
    %102 = vector.load %arg2[%c0_35, %c3] : memref<8x4xf32, #tpu.memory_space<vmem>>, vector<8x1xf32>
    %c0_36 = arith.constant 0 : index
    %c3_37 = arith.constant 3 : index
    %103 = vector.load %arg3[%c0_36, %c3_37] : memref<8x4xf32, #tpu.memory_space<vmem>>, vector<8x1xf32>
    %c0_38 = arith.constant 0 : index
    %c3_39 = arith.constant 3 : index
    %104 = vector.load %arg4[%c0_38, %c3_39] : memref<1x4xf32, #tpu.memory_space<vmem>>, vector<1x1xf32>
    %c0_40 = arith.constant 0 : index
    %c3_41 = arith.constant 3 : index
    %105 = vector.load %arg5[%c0_40, %c3_41] : memref<1x4xf32, #tpu.memory_space<vmem>>, vector<1x1xf32>
    %106 = vector.broadcast %102 : vector<8x1xf32> to vector<8x256xf32>
    %107 = arith.mulf %101, %106 : vector<8x256xf32>
    %cst_42 = arith.constant dense<0.000000e+00> : vector<256xf32>
    %108 = vector.multi_reduction <add>, %107, %cst_42 [0] : vector<8x256xf32> to vector<256xf32>
    %109 = vector.shape_cast %108 : vector<256xf32> to vector<1x256xf32>
    %110 = vector.broadcast %104 : vector<1x1xf32> to vector<1x256xf32>
    %111 = arith.addf %109, %110 : vector<1x256xf32>
    %112 = math.tanh %111 : vector<1x256xf32>
    %113 = arith.mulf %112, %112 : vector<1x256xf32>
    %cst_43 = arith.constant 1.000000e+00 : f32
    %114 = vector.broadcast %cst_43 : f32 to vector<1x256xf32>
    %115 = arith.subf %114, %113 : vector<1x256xf32>
    %116 = vector.broadcast %105 : vector<1x1xf32> to vector<1x256xf32>
    %117 = arith.mulf %115, %116 : vector<1x256xf32>
    %cst_44 = arith.constant 1.000000e+00 : f32
    %118 = vector.broadcast %cst_44 : f32 to vector<1x256xf32>
    %119 = arith.addf %118, %117 : vector<1x256xf32>
    %120 = math.absf %119 : vector<1x256xf32>
    %cst_45 = arith.constant 1.000000e-07 : f32
    %121 = vector.broadcast %cst_45 : f32 to vector<1x256xf32>
    %122 = arith.addf %120, %121 : vector<1x256xf32>
    %123 = math.log %122 : vector<1x256xf32>
    %c3_i32 = arith.constant 3 : i32
    %124 = vector.broadcast %c3_i32 : i32 to vector<4x1xi32>
    %125 = arith.cmpi eq, %1, %124 : vector<4x1xi32>
    %126 = vector.shape_cast %125 : vector<4x1xi1> to vector<4x1xi1>
    %127 = vector.broadcast %126 : vector<4x1xi1> to vector<4x256xi1>
    %128 = vector.shape_cast %123 : vector<1x256xf32> to vector<1x256xf32>
    %129 = vector.broadcast %128 : vector<1x256xf32> to vector<4x256xf32>
    %130 = arith.select %127, %129, %97 : vector<4x256xi1>, vector<4x256xf32>
    %131 = vector.broadcast %103 : vector<8x1xf32> to vector<8x256xf32>
    %132 = vector.broadcast %112 : vector<1x256xf32> to vector<8x256xf32>
    %133 = arith.mulf %131, %132 : vector<8x256xf32>
    %134 = arith.addf %101, %133 : vector<8x256xf32>
    %c0_46 = arith.constant 0 : index
    %c0_47 = arith.constant 0 : index
    %135 = vector.load %arg7[%c0_46, %c0_47] : memref<4x256xf32, #tpu.memory_space<vmem>>, vector<4x256xf32>
    tpu.vector_store %arg7[%c0_46, %c0_47], %130 {strides = array<i32>} : memref<4x256xf32, #tpu.memory_space<vmem>>, vector<4x256xf32>,
    %c0_48 = arith.constant 0 : index
    %c0_49 = arith.constant 0 : index
    %136 = vector.load %arg6[%c0_48, %c0_49] : memref<8x256xf32, #tpu.memory_space<vmem>>, vector<8x256xf32>
    tpu.vector_store %arg6[%c0_48, %c0_49], %134 {strides = array<i32>} : memref<8x256xf32, #tpu.memory_space<vmem>>, vector<8x256xf32>,
    return
  }
  func.func @transform_0(%arg0: i32) -> (i32, i32) {
    %c0_i32 = arith.constant 0 : i32
    %c0_i32_0 = arith.constant 0 : i32
    return %c0_i32, %arg0 : i32, i32
  }
  func.func @transform_1(%arg0: i32) -> (i32, i32) {
    %c0_i32 = arith.constant 0 : i32
    %c0_i32_0 = arith.constant 0 : i32
    %c0_i32_1 = arith.constant 0 : i32
    return %c0_i32, %c0_i32_0 : i32, i32
  }
  func.func @transform_2(%arg0: i32) -> (i32, i32) {
    %c0_i32 = arith.constant 0 : i32
    %c0_i32_0 = arith.constant 0 : i32
    %c0_i32_1 = arith.constant 0 : i32
    return %c0_i32, %c0_i32_0 : i32, i32
  }
  func.func @transform_3(%arg0: i32) -> (i32, i32) {
    %c0_i32 = arith.constant 0 : i32
    %c0_i32_0 = arith.constant 0 : i32
    %c0_i32_1 = arith.constant 0 : i32
    return %c0_i32, %c0_i32_0 : i32, i32
  }
  func.func @transform_4(%arg0: i32) -> (i32, i32) {
    %c0_i32 = arith.constant 0 : i32
    %c0_i32_0 = arith.constant 0 : i32
    %c0_i32_1 = arith.constant 0 : i32
    return %c0_i32, %c0_i32_0 : i32, i32
  }
  func.func @transform_5(%arg0: i32) -> (i32, i32) {
    %c0_i32 = arith.constant 0 : i32
    %c0_i32_0 = arith.constant 0 : i32
    return %c0_i32, %arg0 : i32, i32
  }
  func.func @transform_6(%arg0: i32) -> (i32, i32) {
    %c0_i32 = arith.constant 0 : i32
    %c0_i32_0 = arith.constant 0 : i32
    return %c0_i32, %arg0 : i32, i32
  }
}

</mosaic_0001>

<bundles_post_ra>
// kernel: tpu_custom_call.1
= control target key start
LH: loop header
LB: loop body
LE: loop exit
PB: predicated region body
PF: predicated region fallthrough
CT: control target
= control target key end

     0   :  { %12 = vsyncpa [#allocation3], 0  ;;  %v434_v2 = vmov 0   ;;  %s524_s0 = inlined_call_operand.vmem [shape: f32[8,256], index: 0, kind: input, shape index: {}]   ;;  %s525_s1 = inlined_call_operand.vmem [shape: f32[8,4], index: 1, kind: input, shape index: {}]   ;;  %s526_s2 = inlined_call_operand.vmem [shape: f32[8,4], index: 2, kind: input, shape index: {}]   ;;  %s527_s3 = inlined_call_operand.vmem [shape: f32[1,4], index: 3, kind: input, shape index: {}]   ;;  %s528_s4 = inlined_call_operand.vmem [shape: f32[1,4], index: 4, kind: input, shape index: {}]   ;;  %s529_s5 = inlined_call_operand.hbm [shape: f32[8,256], index: 5, kind: output, shape index: {0}]   ;;  %s530_s6 = inlined_call_operand.hbm [shape: f32[4,256], index: 6, kind: output, shape index: {1}]  }
   0x1   :  { %v28_v0 = vld [vmem:[%s525_s1] sm:$0xff]  ;;  %345 = vset.pattern.permute.xlu0 %v434_v2  ;;  %346 = vset.pattern.permute.xlu1 %v434_v2 }
   0x2   :  { %v29_v1 = vld [vmem:[%s526_s2] sm:$0xff]  ;;  %34 = vperm.xlu0 %345, %v28_v0  }
   0x3   :  { %96 = vperm.xlu1 %346, %v29_v1  }
   0x4   :  { %13 = vsyncpa [#allocation5], 0  ;;  %v30_v3 = vld [vmem:[%s527_s3] sm:$0x1]  ;;  %v435_v4 = vmov 1   ;;  %v436_v5 = vmov 2   ;;  %v26_v14 = vlaneseq }
   0x5   :  { %v437_v6 = vmov 3   ;;  %v31_v7 = vld [vmem:[%s528_s4] sm:$0x1]  ;;  %v25_v9 = vld [vmem:[%s524_s0 + $0x8] sm:$0xff] }
   0x6   :  { %53 = vperm.xlu0 %345, %v30_v3   ;;  %v24_v8 = vld [vmem:[%s524_s0] sm:$0xff]  ;;  %v493_v19 = vshrl.u32 %v26_v14, 7  ;;  %s438_s0 = smov [#allocation2]  }
   0x7   :  { %347 = vset.pattern.permute.xlu1 %v435_v4  ;;  %s317_s4 = sshll.u32 %s438_s0, 4  ;;  %s318_s4 = int_to_ptr.vmem [resolvable:$true] %s317_s4 }
   0x8   :  { %104 = vperm.xlu1 %347, %v28_v0   ;;  %v496_v25 = vsub.s32 0, %v493_v19  ;;  %vm89_vm0 = vcmp.eq.s32.totalorder %v493_v19, 0  ;;  %vm157_vm1 = vcmp.eq.s32.totalorder %v493_v19, 1  ;;  %vm224_vm2 = vcmp.eq.s32.totalorder %v493_v19, 2  ;;  %s390_s30 = scalar_lea.vmem %s318_s4, 256  ;;  %p395_p1 = scmp.lt.s32.totalorder %s318_s4, %s318_s4 }
   0x9   :  { %p391_p0 = scmp.ne.s32.totalorder %s318_s4, %s390_s30  ;;  %p396_p2 = scmp.lt.s32.totalorder %s390_s30, %s390_s30 }
   0xa   :  { %348 = vset.pattern.permute.xlu0 %v435_v4 }
   0xb   :  { %122 = vperm.xlu0 %348, %v30_v3   ;;  %p397_p3 = por %p396_p2, %p395_p1 }
   0xc   :  { %163 = vperm.xlu1 %347, %v29_v1  }
   0xd   :  { %p398_p4 = pnand %p397_p3, %p391_p0 }
   0xf   :  { %350 = vset.pattern.permute.xlu0 %v436_v5 }
  0x10   :  { %349 = vset.pattern.permute.xlu1 %v436_v5  ;;  %189 = vperm.xlu0 %350, %v30_v3  }
  0x11   :  { %171 = vperm.xlu1 %349, %v28_v0  }
  0x14   :  { %352 = vset.pattern.permute.xlu0 %v437_v6 }
  0x15   :  { %230 = vperm.xlu1 %349, %v29_v1   ;;  %256 = vperm.xlu0 %352, %v30_v3  }
  0x19   :  { %351 = vset.pattern.permute.xlu1 %v437_v6  ;;  %355 = vset.pattern.permute.xlu0 %v436_v5 }
  0x1a   :  { %238 = vperm.xlu1 %351, %v28_v0   ;;  %205 = vperm.xlu0 %355, %v31_v7  }
  0x1e   :  { %353 = vset.pattern.permute.xlu1 %v434_v2  ;;  %357 = vset.pattern.permute.xlu0 %v437_v6 }
  0x1f   :  { %70 = vperm.xlu1 %353, %v31_v7  }
  0x23   :  { %354 = vset.pattern.permute.xlu1 %v435_v4 }
  0x24   :  { %138 = vperm.xlu1 %354, %v31_v7  }
  0x28   :  { %356 = vset.pattern.permute.xlu1 %v437_v6 }
  0x29   :  { %272 = vperm.xlu1 %356, %v31_v7  }
  0x2d   :  { %297 = vperm.xlu1 %356, %v29_v1  }
  0x7d   :  { %v35_v10 = vpop.permute.xlu0 %34 }
  0x7e   :  { %v97_v11 = vpop.permute.xlu1 %96  ;;  %v37_v12 = vmul.f32 %v35_v10, %v24_v8  ;;  %v38_v13 = vmul.f32 %v35_v10, %v25_v9 }
  0x80   :  { %v39_v15 = vrot.slane %v37_v12, 4  ;;  %v45_v16 = vrot.slane %v38_v13, 4 }
  0x81   :  { %v54_v27 = vpop.permute.xlu0 %53 }
  0x82   :  { %v40_v17 = vadd.f32 %v39_v15, %v37_v12  ;;  %v46_v18 = vadd.f32 %v45_v16, %v38_v13  ;;  %v59_v32 = vrot.slane %v54_v27, %v496_v25 }
  0x83   :  { %v105_v20 = vpop.permute.xlu1 %104 }
  0x84   :  { %v41_v21 = vrot.slane %v40_v17, 2  ;;  %v47_v22 = vrot.slane %v46_v18, 2 }
  0x86   :  { %v42_v23 = vadd.f32 %v41_v21, %v40_v17  ;;  %v48_v24 = vadd.f32 %v47_v22, %v46_v18  ;;  %v123_v60 = vpop.permute.xlu0 %122 }
  0x87   :  { %v164_v26 = vpop.permute.xlu1 %163  ;;  %v128_v0 = vrot.slane %v123_v60, %v496_v25 }
  0x88   :  { %v43_v28 = vrot.slane %v42_v23, 1  ;;  %v49_v29 = vrot.slane %v48_v24, 1 }
  0x8a   :  { %v44_v30 = vadd.f32 %v43_v28, %v42_v23  ;;  %v50_v31 = vadd.f32 %v49_v29, %v48_v24 }
  0x8c   :  { %v172_v33 = vpop.permute.xlu1 %171  ;;  %v60_v34 = vadd.f32 %v59_v32, %v44_v30  ;;  %v61_v35 = vadd.f32 %v59_v32, %v50_v31 }
  0x8e   :  { %358 = vtanh.f32 %v60_v34 }
  0x8f   :  { %360 = vtanh.f32 %v61_v35 }
  0x90   :  { %v499_v36 = vpop.permute.xlu1 %230 }
  0x95   :  { %v501_v37 = vpop.permute.xlu1 %238 }
  0x9a   :  { %v71_v38 = vpop.permute.xlu1 %70 }
  0x9b   :  { %v359_v39 = vpop.eup %358  ;;  %v76_v43 = vrot.slane %v71_v38, %v496_v25 }
  0x9c   :  { %v361_v40 = vpop.eup %360  ;;  %v99_v41 = vmul.f32 %v359_v39, %v97_v11  ;;  %v64_v42 = vmul.f32 %v359_v39, %v359_v39 }
  0x9d   :  { %v100_v44 = vmul.f32 %v361_v40, %v97_v11  ;;  %v65_v45 = vmul.f32 %v361_v40, %v361_v40 }
  0x9e   :  { %v101_v46 = vadd.f32 %v99_v41, %v24_v8  ;;  %v66_v47 = vsub.f32 1.0, %v64_v42 }
  0x9f   :  { %v102_v48 = vadd.f32 %v100_v44, %v25_v9  ;;  %v67_v49 = vsub.f32 1.0, %v65_v45  ;;  %v139_v8 = vpop.permute.xlu1 %138  ;;  %v190_v44 = vpop.permute.xlu0 %189 }
  0xa0   :  { %v107_v50 = vmul.f32 %v105_v20, %v101_v46  ;;  %v77_v51 = vmul.f32 %v76_v43, %v66_v47  ;;  %v144_v14 = vrot.slane %v139_v8, %v496_v25 }
  0xa1   :  { %v108_v52 = vmul.f32 %v105_v20, %v102_v48  ;;  %v78_v53 = vmul.f32 %v76_v43, %v67_v49 }
  0xa2   :  { %v109_v54 = vrot.slane %v107_v50, 4  ;;  %v79_v6 = vadd.f32 1.0, %v77_v51 }
  0xa3   :  { %v115_v55 = vrot.slane %v108_v52, 4  ;;  %v80_v7 = vadd.f32 1.0, %v78_v53 }
  0xa4   :  { %v110_v56 = vadd.f32 %v109_v54, %v107_v50  ;;  %v81_v10 = vand.u32 2147483647, %v79_v6 }
  0xa5   :  { %v116_v57 = vadd.f32 %v115_v55, %v108_v52  ;;  %v82_v12 = vand.u32 2147483647, %v80_v7 }
  0xa6   :  { %v111_v58 = vrot.slane %v110_v56, 2  ;;  %v83_v21 = vadd.f32 1e-07, %v81_v10 }
  0xa7   :  { %v117_v59 = vrot.slane %v116_v57, 2  ;;  %v84_v24 = vadd.f32 1e-07, %v82_v12 }
  0xa8   :  { %v112_v61 = vadd.f32 %v111_v58, %v110_v56 }
  0xa9   :  { %v118_v62 = vadd.f32 %v117_v59, %v116_v57  ;;  %v257_v59 = vpop.permute.xlu0 %256 }
  0xaa   :  { %v113_v63 = vrot.slane %v112_v61, 1 }
  0xab   :  { %v119_v1 = vrot.slane %v118_v62, 1 }
  0xac   :  { %v114_v2 = vadd.f32 %v113_v63, %v112_v61 }
  0xad   :  { %v120_v3 = vadd.f32 %v119_v1, %v118_v62 }
  0xae   :  { %v129_v4 = vadd.f32 %v128_v0, %v114_v2 }
  0xaf   :  { %v130_v5 = vadd.f32 %v128_v0, %v120_v3  ;;  %v206_v3 = vpop.permute.xlu0 %205 }
  0xb0   :  { %362 = vtanh.f32 %v129_v4  ;;  %v211_v8 = vrot.slane %v206_v3, %v496_v25 }
  0xb1   :  { %364 = vtanh.f32 %v130_v5 }
  0xb2   :  { %366 = vlog2.f32 %v83_v21 }
  0xb3   :  { %368 = vlog2.f32 %v84_v24 }
  0xbd   :  { %v363_v9 = vpop.eup %362 }
  0xbe   :  { %v365_v11 = vpop.eup %364  ;;  %v133_v13 = vmul.f32 %v363_v9, %v363_v9  ;;  %v166_v15 = vmul.f32 %v363_v9, %v164_v26 }
  0xbf   :  { %v134_v16 = vmul.f32 %v365_v11, %v365_v11  ;;  %v167_v17 = vmul.f32 %v365_v11, %v164_v26  ;;  %v367_v54 = vpop.eup %366 }
  0xc0   :  { %v135_v18 = vsub.f32 1.0, %v133_v13  ;;  %v168_v20 = vadd.f32 %v166_v15, %v101_v46  ;;  %v369_v55 = vpop.eup %368  ;;  %v86_v56 = vmul.f32 0.6931472, %v367_v54 }
  0xc1   :  { %v136_v22 = vsub.f32 1.0, %v134_v16  ;;  %v169_v23 = vadd.f32 %v167_v17, %v102_v48  ;;  %v195_v48 = vrot.slane %v190_v44, %v496_v25  ;;  %v88_v57 = vmul.f32 0.6931472, %v369_v55  ;;  %v273_v44 = vpop.permute.xlu1 %272 }
  0xc2   :  { %v145_v27 = vmul.f32 %v144_v14, %v135_v18  ;;  %v174_v28 = vmul.f32 %v172_v33, %v168_v20  ;;  %v92_v63 = vsel %vm89_vm0, %v86_v56, 0.0 }
  0xc3   :  { %v146_v29 = vmul.f32 %v144_v14, %v136_v22  ;;  %v175_v30 = vmul.f32 %v172_v33, %v169_v23  ;;  %v93_v0 = vsel %vm89_vm0, %v88_v57, 0.0 }
  0xc4   :  { %v147_v31 = vadd.f32 1.0, %v145_v27  ;;  %v176_v32 = vrot.slane %v174_v28, 4 }
  0xc5   :  { %v148_v34 = vadd.f32 1.0, %v146_v29  ;;  %v182_v35 = vrot.slane %v175_v30, 4 }
  0xc6   :  { %v149_v38 = vand.u32 2147483647, %v147_v31  ;;  %v177_v39 = vadd.f32 %v176_v32, %v174_v28 }
  0xc7   :  { %v150_v40 = vand.u32 2147483647, %v148_v34  ;;  %v183_v26 = vadd.f32 %v182_v35, %v175_v30 }
  0xc8   :  { %v151_v41 = vadd.f32 1e-07, %v149_v38  ;;  %v178_v42 = vrot.slane %v177_v39, 2 }
  0xc9   :  { %v152_v43 = vadd.f32 1e-07, %v150_v40  ;;  %v184_v45 = vrot.slane %v183_v26, 2 }
  0xca   :  { %370 = vlog2.f32 %v151_v41  ;;  %v179_v46 = vadd.f32 %v178_v42, %v177_v39 }
  0xcb   :  { %372 = vlog2.f32 %v152_v43  ;;  %v185_v47 = vadd.f32 %v184_v45, %v183_v26 }
  0xcc   :  { %v180_v33 = vrot.slane %v179_v46, 1 }
  0xcd   :  { %v186_v49 = vrot.slane %v185_v47, 1 }
  0xce   :  { %v181_v50 = vadd.f32 %v180_v33, %v179_v46 }
  0xcf   :  { %v187_v51 = vadd.f32 %v186_v49, %v185_v47  ;;  %v298_v49 = vpop.permute.xlu1 %297 }
  0xd0   :  { %v196_v52 = vadd.f32 %v195_v48, %v181_v50 }
  0xd1   :  { %v197_v53 = vadd.f32 %v195_v48, %v187_v51 }
  0xd2   :  { %374 = vtanh.f32 %v196_v52 }
  0xd3   :  { %376 = vtanh.f32 %v197_v53  ;;  %v278_v53 = vrot.slane %v273_v44, %v496_v25 }
  0xd7   :  { %v371_v58 = vpop.eup %370 }
  0xd8   :  { %v373_v60 = vpop.eup %372  ;;  %v154_v61 = vmul.f32 0.6931472, %v371_v58 }
  0xd9   :  { %v156_v62 = vmul.f32 0.6931472, %v373_v60 }
  0xda   :  { %v160_v1 = vsel %vm157_vm1, %v154_v61, %v92_v63 }
  0xdb   :  { %v161_v2 = vsel %vm157_vm1, %v156_v62, %v93_v0 }
  0xdf   :  { %v375_v4 = vpop.eup %374 }
  0xe0   :  { %v377_v5 = vpop.eup %376  ;;  %v233_v6 = vmul.f32 %v375_v4, %v499_v36  ;;  %v200_v7 = vmul.f32 %v375_v4, %v375_v4 }
  0xe1   :  { %v234_v9 = vmul.f32 %v377_v5, %v499_v36  ;;  %v201_v10 = vmul.f32 %v377_v5, %v377_v5 }
  0xe2   :  { %v235_v11 = vadd.f32 %v233_v6, %v168_v20  ;;  %v202_v12 = vsub.f32 1.0, %v200_v7 }
  0xe3   :  { %v236_v13 = vadd.f32 %v234_v9, %v169_v23  ;;  %v203_v14 = vsub.f32 1.0, %v201_v10 }
  0xe4   :  { %v241_v15 = vmul.f32 %v501_v37, %v235_v11  ;;  %v212_v16 = vmul.f32 %v211_v8, %v202_v12 }
  0xe5   :  { %v242_v17 = vmul.f32 %v501_v37, %v236_v13  ;;  %v213_v18 = vmul.f32 %v211_v8, %v203_v14  ;;  %v262_v37 = vrot.slane %v257_v59, %v496_v25 }
  0xe6   :  { %v243_v21 = vrot.slane %v241_v15, 4  ;;  %v214_v22 = vadd.f32 1.0, %v212_v16 }
  0xe7   :  { %v249_v24 = vrot.slane %v242_v17, 4  ;;  %v215_v27 = vadd.f32 1.0, %v213_v18 }
  0xe8   :  { %v244_v28 = vadd.f32 %v243_v21, %v241_v15  ;;  %v216_v29 = vand.u32 2147483647, %v214_v22 }
  0xe9   :  { %v250_v30 = vadd.f32 %v249_v24, %v242_v17  ;;  %v217_v31 = vand.u32 2147483647, %v215_v27 }
  0xea   :  { %v245_v36 = vrot.slane %v244_v28, 2  ;;  %v218_v32 = vadd.f32 1e-07, %v216_v29 }
  0xeb   :  { %v251_v20 = vrot.slane %v250_v30, 2  ;;  %v219_v34 = vadd.f32 1e-07, %v217_v31 }
  0xec   :  { %v246_v23 = vadd.f32 %v245_v36, %v244_v28  ;;  %378 = vlog2.f32 %v218_v32 }
  0xed   :  { %v252_v35 = vadd.f32 %v251_v20, %v250_v30  ;;  %380 = vlog2.f32 %v219_v34 }
  0xee   :  { %v247_v38 = vrot.slane %v246_v23, 1 }
  0xef   :  { %v253_v39 = vrot.slane %v252_v35, 1 }
  0xf0   :  { %v248_v40 = vadd.f32 %v247_v38, %v246_v23 }
  0xf1   :  { %v254_v26 = vadd.f32 %v253_v39, %v252_v35 }
  0xf2   :  { %v263_v41 = vadd.f32 %v262_v37, %v248_v40 }
  0xf3   :  { %v264_v42 = vadd.f32 %v262_v37, %v254_v26 }
  0xf4   :  { %382 = vtanh.f32 %v263_v41 }
  0xf5   :  { %384 = vtanh.f32 %v264_v42 }
  0xf9   :  { %v379_v43 = vpop.eup %378 }
  0xfa   :  { %v381_v45 = vpop.eup %380  ;;  %v221_v46 = vmul.f32 0.6931472, %v379_v43 }
  0xfb   :  { %v223_v47 = vmul.f32 0.6931472, %v381_v45 }
  0xfc   :  { %v227_v33 = vsel %vm224_vm2, %v221_v46, %v160_v1 }
  0xfd   :  { %v228_v48 = vsel %vm224_vm2, %v223_v47, %v161_v2 }
 0x101   :  { %v383_v50 = vpop.eup %382 }
 0x102   :  { %v385_v51 = vpop.eup %384  ;;  %v267_v52 = vmul.f32 %v383_v50, %v383_v50  ;;  %v300_v54 = vmul.f32 %v383_v50, %v298_v49 }
 0x103   :  { %v268_v55 = vmul.f32 %v385_v51, %v385_v51  ;;  %v301_v56 = vmul.f32 %v385_v51, %v298_v49 }
 0x104   :  { %v269_v57 = vsub.f32 1.0, %v267_v52  ;;  %v302_v58 = vadd.f32 %v300_v54, %v235_v11 }
 0x105   :  { %v270_v59 = vsub.f32 1.0, %v268_v55  ;;  %v303_v60 = vadd.f32 %v301_v56, %v236_v13 }
 0x106   :  { %v279_v61 = vmul.f32 %v278_v53, %v269_v57  ;;  %309 = vst [vmem:[#allocation2] sm:$0xff] %v302_v58 }
 0x107   :  { %v280_v62 = vmul.f32 %v278_v53, %v270_v59  ;;  %310 = vst [vmem:[#allocation2 + $0x8] sm:$0xff] %v303_v60 }
 0x108   :  { %v281_v63 = vadd.f32 1.0, %v279_v61 }
 0x109   :  { %401 = shalt.err (!%p398_p4)
}
 0x10a   :  { %320 = dma.vmem_to_hbm [thread:$0]  %s318_s4, 256, %s529_s5, [#allocation3]   ;;  %v282_v25 = vadd.f32 1.0, %v280_v62  ;;  %v283_v0 = vand.u32 2147483647, %v281_v63  ;;  %vm291_vm3 = vcmp.eq.s32.totalorder %v493_v19, 3 }
 0x10b   :  { %s439_s9 = smov [#allocation4]  }
 0x10c   :  { %v284_v1 = vand.u32 2147483647, %v282_v25  ;;  %v285_v2 = vadd.f32 1e-07, %v283_v0  ;;  %s327_s10 = sshll.u32 %s439_s9, 4  ;;  %s328_s10 = int_to_ptr.vmem [resolvable:$true] %s327_s10 }
 0x10d   :  { %s410_s5 = scalar_lea.vmem %s328_s10, 128  ;;  %p415_p6 = scmp.lt.s32.totalorder %s328_s10, %s328_s10 }
 0x10e   :  { %v286_v3 = vadd.f32 1e-07, %v284_v1  ;;  %386 = vlog2.f32 %v285_v2  ;;  %p411_p5 = scmp.ne.s32.totalorder %s328_s10, %s410_s5  ;;  %p416_p7 = scmp.lt.s32.totalorder %s410_s5, %s410_s5 }
 0x110   :  { %388 = vlog2.f32 %v286_v3  ;;  %p417_p8 = por %p416_p7, %p415_p6 }
 0x112   :  { %p418_p9 = pnand %p417_p8, %p411_p5 }
 0x11b   :  { %v387_v4 = vpop.eup %386 }
 0x11c   :  { %v288_v6 = vmul.f32 0.6931472, %v387_v4 }
 0x11d   :  { %v389_v5 = vpop.eup %388 }
 0x11e   :  { %v290_v7 = vmul.f32 0.6931472, %v389_v5  ;;  %v294_v8 = vsel %vm291_vm3, %v288_v6, %v227_v33 }
 0x120   :  { %v295_v9 = vsel %vm291_vm3, %v290_v7, %v228_v48 }
 0x121   :  { %v306_v10 = vcombine.low %v294_v8, %v295_v9 }
 0x123   :  { %308 = vst [vmem:[#allocation4] sm:$0xff] %v306_v10 }
 0x124   :  { %421 = shalt.err (!%p418_p9)
}
 0x125   :  { %330 = dma.vmem_to_hbm [thread:$0]  %s328_s10, 128, %s530_s6, [#allocation5]  }
 0x126   :  { %430 = dma.done.wait [#allocation3], 256  }
 0x127   :  { %431 = vsyncadd [#allocation3], 4294967040 }
 0x128   :  { %432 = dma.done.wait [#allocation5], 128  }
 0x129   :  { %433 = vsyncadd [#allocation5], 4294967168 }
 0x12a   :  { %337 = vsyncpa [#allocation3], 1 }
 0x12b   :  { %338 = vsyncpa [#allocation5], 1 }

</bundles_post_ra>
